<compile_context>
chip_gen: v5e
topology: v5e:2x2
jax: 0.10.0
libtpu: 0.0.40
codegen_flags: <defaults>
</compile_context>

<pallas_src>
import functools

import jax
import jax.numpy as jnp
from jax.experimental import pallas as pl
from jax.experimental.pallas import tpu as pltpu

_GELU_K0 = 0.7978845608028654   # sqrt(2/pi)
_GELU_K1 = 0.044715
_SQRT_HALF = 0.7071067811865475


def _gelu_tanh(x):
    # tanh-approximate GELU: one EUP op instead of a long VALU polynomial.
    return 0.5 * x * (1.0 + jnp.tanh(_GELU_K0 * (x + _GELU_K1 * x * x * x)))


def _gelu_erf(x):
    # torch nn.GELU() default (approximate='none'); used only for the
    # host-side parity check.
    return 0.5 * x * (1.0 + jax.lax.erf(x * _SQRT_HALF))


def _fusion_kernel(*refs, num_ops, ln_eps):
    x_refs = refs[:num_ops]
    (w1_ref, b1_ref, ln_g_ref, ln_b_ref,
     w2_ref, b2_ref, w3_ref, b3_ref, o_ref) = refs[num_ops:]

    # ---- gating MLP --------------------------------------------------------
    # Linear(num_ops*D -> 2D): W1 is pre-split into per-op (D, 2D) chunks, so
    # the concatenated [.., num_ops*D] activation never has to be materialized.
    # Dots run in the storage dtype (bf16 in -> native bf16 MXU) and accumulate
    # in f32.
    h = jnp.dot(x_refs[0][...], w1_ref[0], preferred_element_type=jnp.float32)
    for i in range(1, num_ops):
        h = h + jnp.dot(x_refs[i][...], w1_ref[i],
                        preferred_element_type=jnp.float32)
    h = h + b1_ref[...].astype(jnp.float32)

    # LayerNorm(2D): biased variance, eps=1e-5 (torch defaults).  Reuse the
    # centered value for both variance and normalization.
    mu = jnp.mean(h, axis=-1, keepdims=True)
    hc = h - mu
    var = jnp.mean(hc * hc, axis=-1, keepdims=True)
    h = hc * jax.lax.rsqrt(var + ln_eps)
    h = h * ln_g_ref[...].astype(jnp.float32) + ln_b_ref[...].astype(jnp.float32)

    # GELU (tanh approx -> EUP).  Dropout is identity in eval mode.
    h = _gelu_tanh(h)

    # Linear(2D -> D) + GELU.  Cast the f32 activation down to the weight
    # storage dtype (never upcast the weights): bf16 weights keep the MXU on
    # its native fast path; f32 weights make this a no-op cast.
    h2 = jnp.dot(h.astype(w2_ref.dtype), w2_ref[...],
                 preferred_element_type=jnp.float32)
    h2 = _gelu_tanh(h2 + b2_ref[...].astype(jnp.float32))

    # Linear(D -> num_ops)
    logits = jnp.dot(h2.astype(w3_ref.dtype), w3_ref[...],
                     preferred_element_type=jnp.float32)
    logits = logits + b3_ref[...].astype(jnp.float32)

    # softmax over ops.  Exact reciprocal (still EUP-backed): gates sum to 1
    # at f32 precision, matching torch softmax numerics.
    m = jnp.max(logits, axis=-1, keepdims=True)
    e = jnp.exp(logits - m)
    gate = e * pl.reciprocal(jnp.sum(e, axis=-1, keepdims=True), approx=False)

    # ---- weighted sum over ops: pure VPU work on the per-op refs -----------
    acc = x_refs[0][...].astype(jnp.float32) * gate[:, 0:1]
    for i in range(1, num_ops):
        acc = acc + x_refs[i][...].astype(jnp.float32) * gate[:, i:i + 1]

    o_ref[...] = acc.astype(o_ref.dtype)


def _round_up(x, m):
    return (x + m - 1) // m * m


def soft_op_fusion(op_outputs, params, *, num_ops, feature_dim,
                   tile_m=1024, ln_eps=1e-5, interpret=False):
    """op_outputs: list of num_ops arrays, each [B, T, D]. Returns [B, T, D]."""
    assert len(op_outputs) == num_ops
    B, T, D = op_outputs[0].shape
    assert D == feature_dim
    for t in op_outputs:
        assert t.shape == (B, T, D)

    w1, b1, ln_g, ln_b, w2, b2, w3, b3 = params
    H = 2 * feature_dim
    assert w1.shape == (num_ops * D, H)
    w1_split = w1.reshape(num_ops, D, H)  # contiguous -> free reshape

    N = B * T
    # Row tile: as large as possible (per-step overhead ~0.35us), but
    # guarantee >= 2 grid steps whenever N allows so the "parallel" axis can
    # be sharded across both TensorCores on v7x megacore.
    tm = min(tile_m, _round_up(N, 8))
    if N > 8 and (N + tm - 1) // tm < 2:
        tm = max(8, _round_up((N + 1) // 2, 8))
    grid = (N + tm - 1) // tm
    # No wrapper-side padding: Pallas masks the partial last block (rows past
    # N are row-independent garbage that is never written back), so we avoid
    # an extra HBM round-trip of every op tensor for non-multiple N.

    xs = [t.reshape(N, D) for t in op_outputs]

    x_specs = [pl.BlockSpec((tm, D), lambda i: (i, 0)) for _ in range(num_ops)]
    param_specs = [
        pl.BlockSpec((num_ops, D, H), lambda i: (0, 0, 0)),   # W1 (per-op split)
        pl.BlockSpec((1, H), lambda i: (0, 0)),               # b1
        pl.BlockSpec((1, H), lambda i: (0, 0)),               # LN gamma
        pl.BlockSpec((1, H), lambda i: (0, 0)),               # LN beta
        pl.BlockSpec((H, D), lambda i: (0, 0)),               # W2
        pl.BlockSpec((1, D), lambda i: (0, 0)),               # b2
        pl.BlockSpec((D, num_ops), lambda i: (0, 0)),         # W3
        pl.BlockSpec((1, num_ops), lambda i: (0, 0)),         # b3
    ]

    kernel = functools.partial(_fusion_kernel, num_ops=num_ops, ln_eps=ln_eps)

    itemsize = jnp.dtype(op_outputs[0].dtype).itemsize
    flops = int(
        2 * N * (num_ops * D * H + H * D + D * num_ops)        # matmuls
        + N * (20 * H + 12 * D + 10 * num_ops + num_ops * 2 * D))
    transcendentals = int(N * (H + D + num_ops + 1))           # tanh x2, exp, rcp
    bytes_accessed = int(
        (num_ops + 1) * N * D * itemsize
        + sum(int(p.size) * jnp.dtype(p.dtype).itemsize for p in params))

    out = pl.pallas_call(
        kernel,
        out_shape=jax.ShapeDtypeStruct((N, D), op_outputs[0].dtype),
        grid_spec=pltpu.PrefetchScalarGridSpec(
            num_scalar_prefetch=0,
            grid=(grid,),
            in_specs=x_specs + param_specs,
            out_specs=pl.BlockSpec((tm, D), lambda i: (i, 0)),
        ),
        compiler_params=pltpu.CompilerParams(
            dimension_semantics=("parallel",),
            # Actual footprint is a few MiB at tm=1024; stay well under the
            # 64 MiB physical VMEM of a v7x TensorCore while leaving pipeline
            # headroom.
            vmem_limit_bytes=16 * 1024 * 1024,
        ),
        cost_estimate=pl.CostEstimate(
            flops=flops,
            transcendentals=transcendentals,
            bytes_accessed=bytes_accessed,
        ),
        interpret=interpret,
    )(*xs, w1_split, b1, ln_g, ln_b, w2, b2, w3, b3)

    return out.reshape(B, T, feature_dim)


def init_params(key, num_ops, feature_dim, dtype=jnp.float32):
    D = feature_dim
    H = 2 * D
    ks = jax.random.split(key, 6)
    # weights stored as [in, out] (transposed vs torch Linear's [out, in])
    w1 = jax.random.normal(ks[0], (num_ops * D, H), dtype) * 0.05
    b1 = jax.random.normal(ks[1], (1, H), dtype) * 0.01
    ln_g = 1.0 + 0.01 * jax.random.normal(ks[2], (1, H), dtype)
    ln_b = 0.01 * jax.random.normal(ks[3], (1, H), dtype)
    w2 = jax.random.normal(ks[4], (H, D), dtype) * 0.05
    b2 = jnp.zeros((1, D), dtype)
    w3 = jax.random.normal(ks[5], (D, num_ops), dtype) * 0.05
    b3 = jnp.zeros((1, num_ops), dtype)
    return (w1, b1, ln_g, ln_b, w2, b2, w3, b3)


def reference_jax(op_outputs, params, ln_eps=1e-5, gelu=_gelu_tanh):
    """Pure-JAX (f32) reference of the same forward for a sanity check."""
    w1, b1, ln_g, ln_b, w2, b2, w3, b3 = params
    f32 = jnp.float32
    x_cat = jnp.concatenate([t.astype(f32) for t in op_outputs], axis=-1)
    x_stk = jnp.stack([t.astype(f32) for t in op_outputs], axis=-1)
    h = x_cat @ w1.astype(f32) + b1.astype(f32)
    mu = h.mean(-1, keepdims=True)
    var = ((h - mu) ** 2).mean(-1, keepdims=True)
    h = (h - mu) / jnp.sqrt(var + ln_eps) * ln_g.astype(f32) + ln_b.astype(f32)
    h = gelu(h)
    h2 = gelu(h @ w2.astype(f32) + b2.astype(f32))
    logits = h2 @ w3.astype(f32) + b3.astype(f32)
    gate = jax.nn.softmax(logits, axis=-1)                    # [B,T,num_ops]
    return (x_stk * gate[..., None, :]).sum(-1)


if __name__ == "__main__":
    num_ops = 4
    feature_dim = 32

    key = jax.random.PRNGKey(0)
    k_p, k_x = jax.random.split(key)
    params = init_params(k_p, num_ops, feature_dim)
    x_keys = jax.random.split(k_x, num_ops)

    # Case 1: small aligned shape (B=2, T=8) -> 16 tokens, grid=(2,).
    B, T = 2, 8
    op_outputs = [jax.random.normal(k, (B, T, feature_dim), jnp.float32)
                  for k in x_keys]
    out = jax.block_until_ready(
        soft_op_fusion(op_outputs, params,
                       num_ops=num_ops, feature_dim=feature_dim))
    ref = reference_jax(op_outputs, params)
    assert out.shape == (B, T, feature_dim)
    err = float(jnp.max(jnp.abs(out - ref)))
    assert jnp.allclose(out, ref, rtol=2e-3, atol=2e-3), f"mismatch (case 1): {err}"
    # Parity bound vs torch's exact-erf GELU (tanh-approx trade-off).
    ref_erf = reference_jax(op_outputs, params, gelu=_gelu_erf)
    err_erf = float(jnp.max(jnp.abs(out - ref_erf)))
    assert jnp.allclose(out, ref_erf, atol=2.5e-2), f"erf parity drifted: {err_erf}"

    # Case 2: token count not a multiple of the tile (exercises the masked
    # partial last block; no wrapper-side padding / extra HBM traffic).
    B2, T2 = 2, 9
    op_outputs2 = [jax.random.normal(k, (B2, T2, feature_dim), jnp.float32)
                   for k in jax.random.split(jax.random.PRNGKey(1), num_ops)]
    out2 = jax.block_until_ready(
        soft_op_fusion(op_outputs2, params,
                       num_ops=num_ops, feature_dim=feature_dim))
    ref2 = reference_jax(op_outputs2, params)
    assert out2.shape == (B2, T2, feature_dim)
    err2 = float(jnp.max(jnp.abs(out2 - ref2)))
    assert jnp.allclose(out2, ref2, rtol=2e-3, atol=2e-3), f"mismatch (case 2): {err2}"

    # Case 3: bf16 storage dtype -> native bf16 MXU path (v6e/v7x) and halved
    # HBM read traffic.  Tolerance is loose: intermediates round to bf16.
    params_bf16 = jax.tree_util.tree_map(lambda p: p.astype(jnp.bfloat16), params)
    B3, T3 = 2, 16
    op_outputs3 = [
        jax.random.normal(k, (B3, T3, feature_dim), jnp.float32).astype(jnp.bfloat16)
        for k in jax.random.split(jax.random.PRNGKey(2), num_ops)]
    out3 = jax.block_until_ready(
        soft_op_fusion(op_outputs3, params_bf16,
                       num_ops=num_ops, feature_dim=feature_dim))
    ref3 = reference_jax(op_outputs3, params_bf16)
    assert out3.shape == (B3, T3, feature_dim)
    err3 = float(jnp.max(jnp.abs(out3.astype(jnp.float32) - ref3)))
    assert err3 < 1e-1, f"mismatch (case 3, bf16): {err3}"

    print("KERNEL_OK")
</pallas_src>

<mosaic_0001>
module attributes {stable_mosaic.version = 11 : i64} {
  func.func @_fusion_kernel(%arg0: i32, %arg1: memref<8x32xf32, #tpu.memory_space<vmem>>, %arg2: memref<8x32xf32, #tpu.memory_space<vmem>>, %arg3: memref<8x32xf32, #tpu.memory_space<vmem>>, %arg4: memref<8x32xf32, #tpu.memory_space<vmem>>, %arg5: memref<4x32x64xf32, #tpu.memory_space<vmem>>, %arg6: memref<1x64xf32, #tpu.memory_space<vmem>>, %arg7: memref<1x64xf32, #tpu.memory_space<vmem>>, %arg8: memref<1x64xf32, #tpu.memory_space<vmem>>, %arg9: memref<64x32xf32, #tpu.memory_space<vmem>>, %arg10: memref<1x32xf32, #tpu.memory_space<vmem>>, %arg11: memref<32x4xf32, #tpu.memory_space<vmem>>, %arg12: memref<1x4xf32, #tpu.memory_space<vmem>>, %arg13: memref<8x32xf32, #tpu.memory_space<vmem>>) attributes {dimension_semantics = [#tpu.dimension_semantics<parallel>], iteration_bounds = array<i64: 2>, scalar_prefetch = 0 : i64, scratch_operands = 0 : i64, tpu.core_type = #tpu.core_type<tc>, window_params = [{transform_indices = @transform_0, window_bounds = array<i64: 8, 32>}, {transform_indices = @transform_1, window_bounds = array<i64: 8, 32>}, {transform_indices = @transform_2, window_bounds = array<i64: 8, 32>}, {transform_indices = @transform_3, window_bounds = array<i64: 8, 32>}, {pipeline_mode = #tpu.pipeline_mode<synchronous>, transform_indices = @transform_4, window_bounds = array<i64: 4, 32, 64>}, {pipeline_mode = #tpu.pipeline_mode<synchronous>, transform_indices = @transform_5, window_bounds = array<i64: 1, 64>}, {pipeline_mode = #tpu.pipeline_mode<synchronous>, transform_indices = @transform_6, window_bounds = array<i64: 1, 64>}, {pipeline_mode = #tpu.pipeline_mode<synchronous>, transform_indices = @transform_7, window_bounds = array<i64: 1, 64>}, {pipeline_mode = #tpu.pipeline_mode<synchronous>, transform_indices = @transform_8, window_bounds = array<i64: 64, 32>}, {pipeline_mode = #tpu.pipeline_mode<synchronous>, transform_indices = @transform_9, window_bounds = array<i64: 1, 32>}, {pipeline_mode = #tpu.pipeline_mode<synchronous>, transform_indices = @transform_10, window_bounds = array<i64: 32, 4>}, {pipeline_mode = #tpu.pipeline_mode<synchronous>, transform_indices = @transform_11, window_bounds = array<i64: 1, 4>}, {transform_indices = @transform_12, window_bounds = array<i64: 8, 32>}]} {
    %c0 = arith.constant 0 : index
    %c0_0 = arith.constant 0 : index
    %0 = vector.load %arg1[%c0, %c0_0] : memref<8x32xf32, #tpu.memory_space<vmem>>, vector<8x32xf32>
    %c0_1 = arith.constant 0 : index
    %c0_2 = arith.constant 0 : index
    %c0_3 = arith.constant 0 : index
    %1 = vector.load %arg5[%c0_1, %c0_2, %c0_3] : memref<4x32x64xf32, #tpu.memory_space<vmem>>, vector<1x32x64xf32>
    %2 = vector.shape_cast %1 : vector<1x32x64xf32> to vector<32x64xf32>
    %cst = arith.constant dense<0.000000e+00> : vector<8x64xf32>
    %3 = tpu.matmul %0, %2, %cst {dimension_numbers = #tpu.dot_dimension_numbers<[1], [0], [0], [1], [0, 0, 1, 1], [], []>} : vector<8x32xf32>, vector<32x64xf32>, vector<8x64xf32> -> vector<8x64xf32>
    %c0_4 = arith.constant 0 : index
    %c0_5 = arith.constant 0 : index
    %4 = vector.load %arg2[%c0_4, %c0_5] : memref<8x32xf32, #tpu.memory_space<vmem>>, vector<8x32xf32>
    %c1 = arith.constant 1 : index
    %c0_6 = arith.constant 0 : index
    %c0_7 = arith.constant 0 : index
    %5 = vector.load %arg5[%c1, %c0_6, %c0_7] : memref<4x32x64xf32, #tpu.memory_space<vmem>>, vector<1x32x64xf32>
    %6 = vector.shape_cast %5 : vector<1x32x64xf32> to vector<32x64xf32>
    %cst_8 = arith.constant dense<0.000000e+00> : vector<8x64xf32>
    %7 = tpu.matmul %4, %6, %cst_8 {dimension_numbers = #tpu.dot_dimension_numbers<[1], [0], [0], [1], [0, 0, 1, 1], [], []>} : vector<8x32xf32>, vector<32x64xf32>, vector<8x64xf32> -> vector<8x64xf32>
    %8 = arith.addf %3, %7 : vector<8x64xf32>
    %c0_9 = arith.constant 0 : index
    %c0_10 = arith.constant 0 : index
    %9 = vector.load %arg3[%c0_9, %c0_10] : memref<8x32xf32, #tpu.memory_space<vmem>>, vector<8x32xf32>
    %c2 = arith.constant 2 : index
    %c0_11 = arith.constant 0 : index
    %c0_12 = arith.constant 0 : index
    %10 = vector.load %arg5[%c2, %c0_11, %c0_12] : memref<4x32x64xf32, #tpu.memory_space<vmem>>, vector<1x32x64xf32>
    %11 = vector.shape_cast %10 : vector<1x32x64xf32> to vector<32x64xf32>
    %cst_13 = arith.constant dense<0.000000e+00> : vector<8x64xf32>
    %12 = tpu.matmul %9, %11, %cst_13 {dimension_numbers = #tpu.dot_dimension_numbers<[1], [0], [0], [1], [0, 0, 1, 1], [], []>} : vector<8x32xf32>, vector<32x64xf32>, vector<8x64xf32> -> vector<8x64xf32>
    %13 = arith.addf %8, %12 : vector<8x64xf32>
    %c0_14 = arith.constant 0 : index
    %c0_15 = arith.constant 0 : index
    %14 = vector.load %arg4[%c0_14, %c0_15] : memref<8x32xf32, #tpu.memory_space<vmem>>, vector<8x32xf32>
    %c3 = arith.constant 3 : index
    %c0_16 = arith.constant 0 : index
    %c0_17 = arith.constant 0 : index
    %15 = vector.load %arg5[%c3, %c0_16, %c0_17] : memref<4x32x64xf32, #tpu.memory_space<vmem>>, vector<1x32x64xf32>
    %16 = vector.shape_cast %15 : vector<1x32x64xf32> to vector<32x64xf32>
    %cst_18 = arith.constant dense<0.000000e+00> : vector<8x64xf32>
    %17 = tpu.matmul %14, %16, %cst_18 {dimension_numbers = #tpu.dot_dimension_numbers<[1], [0], [0], [1], [0, 0, 1, 1], [], []>} : vector<8x32xf32>, vector<32x64xf32>, vector<8x64xf32> -> vector<8x64xf32>
    %18 = arith.addf %13, %17 : vector<8x64xf32>
    %c0_19 = arith.constant 0 : index
    %c0_20 = arith.constant 0 : index
    %19 = vector.load %arg6[%c0_19, %c0_20] : memref<1x64xf32, #tpu.memory_space<vmem>>, vector<1x64xf32>
    %20 = vector.broadcast %19 : vector<1x64xf32> to vector<8x64xf32>
    %21 = arith.addf %18, %20 : vector<8x64xf32>
    %cst_21 = arith.constant dense<0.000000e+00> : vector<8xf32>
    %22 = vector.multi_reduction <add>, %21, %cst_21 [1] : vector<8x64xf32> to vector<8xf32>
    %23 = vector.shape_cast %22 : vector<8xf32> to vector<8x1xf32>
    %cst_22 = arith.constant 6.400000e+01 : f32
    %24 = vector.broadcast %cst_22 : f32 to vector<8x1xf32>
    %25 = arith.divf %23, %24 : vector<8x1xf32>
    %26 = vector.broadcast %25 : vector<8x1xf32> to vector<8x64xf32>
    %27 = arith.subf %21, %26 : vector<8x64xf32>
    %28 = arith.mulf %27, %27 : vector<8x64xf32>
    %cst_23 = arith.constant dense<0.000000e+00> : vector<8xf32>
    %29 = vector.multi_reduction <add>, %28, %cst_23 [1] : vector<8x64xf32> to vector<8xf32>
    %30 = vector.shape_cast %29 : vector<8xf32> to vector<8x1xf32>
    %cst_24 = arith.constant 6.400000e+01 : f32
    %31 = vector.broadcast %cst_24 : f32 to vector<8x1xf32>
    %32 = arith.divf %30, %31 : vector<8x1xf32>
    %cst_25 = arith.constant 9.99999974E-6 : f32
    %33 = vector.broadcast %cst_25 : f32 to vector<8x1xf32>
    %34 = arith.addf %32, %33 : vector<8x1xf32>
    %35 = math.rsqrt %34 : vector<8x1xf32>
    %36 = vector.broadcast %35 : vector<8x1xf32> to vector<8x64xf32>
    %37 = arith.mulf %27, %36 : vector<8x64xf32>
    %c0_26 = arith.constant 0 : index
    %c0_27 = arith.constant 0 : index
    %38 = vector.load %arg7[%c0_26, %c0_27] : memref<1x64xf32, #tpu.memory_space<vmem>>, vector<1x64xf32>
    %39 = vector.broadcast %38 : vector<1x64xf32> to vector<8x64xf32>
    %40 = arith.mulf %37, %39 : vector<8x64xf32>
    %c0_28 = arith.constant 0 : index
    %c0_29 = arith.constant 0 : index
    %41 = vector.load %arg8[%c0_28, %c0_29] : memref<1x64xf32, #tpu.memory_space<vmem>>, vector<1x64xf32>
    %42 = vector.broadcast %41 : vector<1x64xf32> to vector<8x64xf32>
    %43 = arith.addf %40, %42 : vector<8x64xf32>
    %cst_30 = arith.constant 5.000000e-01 : f32
    %44 = vector.broadcast %cst_30 : f32 to vector<8x64xf32>
    %45 = arith.mulf %44, %43 : vector<8x64xf32>
    %cst_31 = arith.constant 4.471500e-02 : f32
    %46 = vector.broadcast %cst_31 : f32 to vector<8x64xf32>
    %47 = arith.mulf %46, %43 : vector<8x64xf32>
    %48 = arith.mulf %47, %43 : vector<8x64xf32>
    %49 = arith.mulf %48, %43 : vector<8x64xf32>
    %50 = arith.addf %43, %49 : vector<8x64xf32>
    %cst_32 = arith.constant 0.797884583 : f32
    %51 = vector.broadcast %cst_32 : f32 to vector<8x64xf32>
    %52 = arith.mulf %51, %50 : vector<8x64xf32>
    %53 = math.tanh %52 : vector<8x64xf32>
    %cst_33 = arith.constant 1.000000e+00 : f32
    %54 = vector.broadcast %cst_33 : f32 to vector<8x64xf32>
    %55 = arith.addf %54, %53 : vector<8x64xf32>
    %56 = arith.mulf %45, %55 : vector<8x64xf32>
    %c0_34 = arith.constant 0 : index
    %c0_35 = arith.constant 0 : index
    %57 = vector.load %arg9[%c0_34, %c0_35] : memref<64x32xf32, #tpu.memory_space<vmem>>, vector<64x32xf32>
    %cst_36 = arith.constant dense<0.000000e+00> : vector<8x32xf32>
    %58 = tpu.matmul %56, %57, %cst_36 {dimension_numbers = #tpu.dot_dimension_numbers<[1], [0], [0], [1], [0, 0, 1, 1], [], []>} : vector<8x64xf32>, vector<64x32xf32>, vector<8x32xf32> -> vector<8x32xf32>
    %c0_37 = arith.constant 0 : index
    %c0_38 = arith.constant 0 : index
    %59 = vector.load %arg10[%c0_37, %c0_38] : memref<1x32xf32, #tpu.memory_space<vmem>>, vector<1x32xf32>
    %60 = vector.broadcast %59 : vector<1x32xf32> to vector<8x32xf32>
    %61 = arith.addf %58, %60 : vector<8x32xf32>
    %cst_39 = arith.constant 5.000000e-01 : f32
    %62 = vector.broadcast %cst_39 : f32 to vector<8x32xf32>
    %63 = arith.mulf %62, %61 : vector<8x32xf32>
    %cst_40 = arith.constant 4.471500e-02 : f32
    %64 = vector.broadcast %cst_40 : f32 to vector<8x32xf32>
    %65 = arith.mulf %64, %61 : vector<8x32xf32>
    %66 = arith.mulf %65, %61 : vector<8x32xf32>
    %67 = arith.mulf %66, %61 : vector<8x32xf32>
    %68 = arith.addf %61, %67 : vector<8x32xf32>
    %cst_41 = arith.constant 0.797884583 : f32
    %69 = vector.broadcast %cst_41 : f32 to vector<8x32xf32>
    %70 = arith.mulf %69, %68 : vector<8x32xf32>
    %71 = math.tanh %70 : vector<8x32xf32>
    %cst_42 = arith.constant 1.000000e+00 : f32
    %72 = vector.broadcast %cst_42 : f32 to vector<8x32xf32>
    %73 = arith.addf %72, %71 : vector<8x32xf32>
    %74 = arith.mulf %63, %73 : vector<8x32xf32>
    %c0_43 = arith.constant 0 : index
    %c0_44 = arith.constant 0 : index
    %75 = vector.load %arg11[%c0_43, %c0_44] : memref<32x4xf32, #tpu.memory_space<vmem>>, vector<32x4xf32>
    %cst_45 = arith.constant dense<0.000000e+00> : vector<8x4xf32>
    %76 = tpu.matmul %74, %75, %cst_45 {dimension_numbers = #tpu.dot_dimension_numbers<[1], [0], [0], [1], [0, 0, 1, 1], [], []>} : vector<8x32xf32>, vector<32x4xf32>, vector<8x4xf32> -> vector<8x4xf32>
    %c0_46 = arith.constant 0 : index
    %c0_47 = arith.constant 0 : index
    %77 = vector.load %arg12[%c0_46, %c0_47] : memref<1x4xf32, #tpu.memory_space<vmem>>, vector<1x4xf32>
    %78 = vector.broadcast %77 : vector<1x4xf32> to vector<8x4xf32>
    %79 = arith.addf %76, %78 : vector<8x4xf32>
    %cst_48 = arith.constant dense<0xFF800000> : vector<8xf32>
    %80 = vector.multi_reduction <maximumf>, %79, %cst_48 [1] : vector<8x4xf32> to vector<8xf32>
    %81 = vector.shape_cast %80 : vector<8xf32> to vector<8x1xf32>
    %82 = vector.broadcast %81 : vector<8x1xf32> to vector<8x4xf32>
    %83 = arith.subf %79, %82 : vector<8x4xf32>
    %84 = math.exp %83 : vector<8x4xf32>
    %cst_49 = arith.constant dense<0.000000e+00> : vector<8xf32>
    %85 = vector.multi_reduction <add>, %84, %cst_49 [1] : vector<8x4xf32> to vector<8xf32>
    %86 = vector.shape_cast %85 : vector<8xf32> to vector<8x1xf32>
    %87 = tpu.reciprocal %86 : vector<8x1xf32> -> vector<8x1xf32>
    %88 = vector.broadcast %87 : vector<8x1xf32> to vector<8x4xf32>
    %89 = arith.mulf %84, %88 : vector<8x4xf32>
    %c0_50 = arith.constant 0 : index
    %c0_51 = arith.constant 0 : index
    %90 = vector.load %arg1[%c0_50, %c0_51] : memref<8x32xf32, #tpu.memory_space<vmem>>, vector<8x32xf32>
    %91 = vector.extract_strided_slice %89 {offsets = [0, 0], sizes = [8, 1], strides = [1, 1]} : vector<8x4xf32> to vector<8x1xf32>
    %92 = vector.broadcast %91 : vector<8x1xf32> to vector<8x32xf32>
    %93 = arith.mulf %90, %92 : vector<8x32xf32>
    %c0_52 = arith.constant 0 : index
    %c0_53 = arith.constant 0 : index
    %94 = vector.load %arg2[%c0_52, %c0_53] : memref<8x32xf32, #tpu.memory_space<vmem>>, vector<8x32xf32>
    %95 = vector.extract_strided_slice %89 {offsets = [0, 1], sizes = [8, 1], strides = [1, 1]} : vector<8x4xf32> to vector<8x1xf32>
    %96 = vector.broadcast %95 : vector<8x1xf32> to vector<8x32xf32>
    %97 = arith.mulf %94, %96 : vector<8x32xf32>
    %98 = arith.addf %93, %97 : vector<8x32xf32>
    %c0_54 = arith.constant 0 : index
    %c0_55 = arith.constant 0 : index
    %99 = vector.load %arg3[%c0_54, %c0_55] : memref<8x32xf32, #tpu.memory_space<vmem>>, vector<8x32xf32>
    %100 = vector.extract_strided_slice %89 {offsets = [0, 2], sizes = [8, 1], strides = [1, 1]} : vector<8x4xf32> to vector<8x1xf32>
    %101 = vector.broadcast %100 : vector<8x1xf32> to vector<8x32xf32>
    %102 = arith.mulf %99, %101 : vector<8x32xf32>
    %103 = arith.addf %98, %102 : vector<8x32xf32>
    %c0_56 = arith.constant 0 : index
    %c0_57 = arith.constant 0 : index
    %104 = vector.load %arg4[%c0_56, %c0_57] : memref<8x32xf32, #tpu.memory_space<vmem>>, vector<8x32xf32>
    %105 = vector.extract_strided_slice %89 {offsets = [0, 3], sizes = [8, 1], strides = [1, 1]} : vector<8x4xf32> to vector<8x1xf32>
    %106 = vector.broadcast %105 : vector<8x1xf32> to vector<8x32xf32>
    %107 = arith.mulf %104, %106 : vector<8x32xf32>
    %108 = arith.addf %103, %107 : vector<8x32xf32>
    %c0_58 = arith.constant 0 : index
    %c0_59 = arith.constant 0 : index
    %109 = vector.load %arg13[%c0_58, %c0_59] : memref<8x32xf32, #tpu.memory_space<vmem>>, vector<8x32xf32>
    tpu.vector_store %arg13[%c0_58, %c0_59], %108 {strides = array<i32>} : memref<8x32xf32, #tpu.memory_space<vmem>>, vector<8x32xf32>,
    return
  }
  func.func @transform_0(%arg0: i32) -> (i32, i32) {
    %c0_i32 = arith.constant 0 : i32
    %c0_i32_0 = arith.constant 0 : i32
    return %arg0, %c0_i32 : i32, i32
  }
  func.func @transform_1(%arg0: i32) -> (i32, i32) {
    %c0_i32 = arith.constant 0 : i32
    %c0_i32_0 = arith.constant 0 : i32
    return %arg0, %c0_i32 : i32, i32
  }
  func.func @transform_2(%arg0: i32) -> (i32, i32) {
    %c0_i32 = arith.constant 0 : i32
    %c0_i32_0 = arith.constant 0 : i32
    return %arg0, %c0_i32 : i32, i32
  }
  func.func @transform_3(%arg0: i32) -> (i32, i32) {
    %c0_i32 = arith.constant 0 : i32
    %c0_i32_0 = arith.constant 0 : i32
    return %arg0, %c0_i32 : i32, i32
  }
  func.func @transform_4(%arg0: i32) -> (i32, i32, i32) {
    %c0_i32 = arith.constant 0 : i32
    %c0_i32_0 = arith.constant 0 : i32
    %c0_i32_1 = arith.constant 0 : i32
    %c0_i32_2 = arith.constant 0 : i32
    return %c0_i32, %c0_i32_0, %c0_i32_1 : i32, i32, i32
  }
  func.func @transform_5(%arg0: i32) -> (i32, i32) {
    %c0_i32 = arith.constant 0 : i32
    %c0_i32_0 = arith.constant 0 : i32
    %c0_i32_1 = arith.constant 0 : i32
    return %c0_i32, %c0_i32_0 : i32, i32
  }
  func.func @transform_6(%arg0: i32) -> (i32, i32) {
    %c0_i32 = arith.constant 0 : i32
    %c0_i32_0 = arith.constant 0 : i32
    %c0_i32_1 = arith.constant 0 : i32
    return %c0_i32, %c0_i32_0 : i32, i32
  }
  func.func @transform_7(%arg0: i32) -> (i32, i32) {
    %c0_i32 = arith.constant 0 : i32
    %c0_i32_0 = arith.constant 0 : i32
    %c0_i32_1 = arith.constant 0 : i32
    return %c0_i32, %c0_i32_0 : i32, i32
  }
  func.func @transform_8(%arg0: i32) -> (i32, i32) {
    %c0_i32 = arith.constant 0 : i32
    %c0_i32_0 = arith.constant 0 : i32
    %c0_i32_1 = arith.constant 0 : i32
    return %c0_i32, %c0_i32_0 : i32, i32
  }
  func.func @transform_9(%arg0: i32) -> (i32, i32) {
    %c0_i32 = arith.constant 0 : i32
    %c0_i32_0 = arith.constant 0 : i32
    %c0_i32_1 = arith.constant 0 : i32
    return %c0_i32, %c0_i32_0 : i32, i32
  }
  func.func @transform_10(%arg0: i32) -> (i32, i32) {
    %c0_i32 = arith.constant 0 : i32
    %c0_i32_0 = arith.constant 0 : i32
    %c0_i32_1 = arith.constant 0 : i32
    return %c0_i32, %c0_i32_0 : i32, i32
  }
  func.func @transform_11(%arg0: i32) -> (i32, i32) {
    %c0_i32 = arith.constant 0 : i32
    %c0_i32_0 = arith.constant 0 : i32
    %c0_i32_1 = arith.constant 0 : i32
    return %c0_i32, %c0_i32_0 : i32, i32
  }
  func.func @transform_12(%arg0: i32) -> (i32, i32) {
    %c0_i32 = arith.constant 0 : i32
    %c0_i32_0 = arith.constant 0 : i32
    return %arg0, %c0_i32 : i32, i32
  }
}

</mosaic_0001>

<bundles_post_ra>
// kernel: tpu_custom_call.1
= control target key start
LH: loop header
LB: loop body
LE: loop exit
PB: predicated region body
PF: predicated region fallthrough
CT: control target
= control target key end

     0   :  { %s1726_s0 = inlined_call_operand.hbm [shape: f32[16,32], index: 0, kind: input, shape index: {}]   ;;  %s1727_s1 = inlined_call_operand.hbm [shape: f32[16,32], index: 1, kind: input, shape index: {}]   ;;  %s1728_s2 = inlined_call_operand.hbm [shape: f32[16,32], index: 2, kind: input, shape index: {}]   ;;  %s1729_s3 = inlined_call_operand.hbm [shape: f32[16,32], index: 3, kind: input, shape index: {}]   ;;  %s1730_s4 = inlined_call_operand.vmem [shape: f32[4,32,64], index: 4, kind: input, shape index: {}]   ;;  %s1731_s5 = inlined_call_operand.vmem [shape: f32[1,64], index: 5, kind: input, shape index: {}]   ;;  %s1732_s6 = inlined_call_operand.vmem [shape: f32[1,64], index: 6, kind: input, shape index: {}]   ;;  %s1733_s7 = inlined_call_operand.vmem [shape: f32[1,64], index: 7, kind: input, shape index: {}]   ;;  %s1734_s8 = inlined_call_operand.vmem [shape: f32[64,32], index: 8, kind: input, shape index: {}]   ;;  %s1735_s9 = inlined_call_operand.vmem [shape: f32[1,32], index: 9, kind: input, shape index: {}]   ;;  %s1736_s10 = inlined_call_operand.vmem [shape: f32[32,4], index: 10, kind: input, shape index: {}]   ;;  %s1737_s11 = inlined_call_operand.vmem [shape: f32[1,4], index: 11, kind: input, shape index: {}]   ;;  %s1738_s12 = inlined_call_operand.hbm [shape: f32[16,32], index: 12, kind: output, shape index: {}]  }
   0x1   :  { %1749 = sst [smem:[#allocation22_spill]] %s1727_s1 }
   0x2   :  { %1750 = sst [smem:[#allocation23_spill]] %s1735_s9 }
   0x3   :  { %1751 = sst [smem:[#allocation24_spill]] %s1736_s10 }
   0x4   :  { %1752 = sst [smem:[#allocation25_spill]] %s1737_s11 }
   0x5   :  { %1753 = sst [smem:[#allocation26_spill]] %s1738_s12 }
   0x6   :  { %17 = vsyncpa [#allocation3], 0 }
   0x7   :  { %19 = vsyncpa [#allocation3 + $0x1], 0 }
   0x8   :  { %20 = vsyncpa [#allocation6], 0 }
   0x9   :  { %22 = vsyncpa [#allocation6 + $0x1], 0 }
   0xa   :  { %23 = vsyncpa [#allocation9], 0 }
   0xb   :  { %25 = vsyncpa [#allocation9 + $0x1], 0 }
   0xc   :  { %26 = vsyncpa [#allocation4], 0 }
   0xd   :  { %28 = vsyncpa [#allocation4 + $0x1], 0  ;;  %s1387_s21 = smov 0   ;;  %s1389_s22 = smov 0  }
   0xe   :  { %s1391_s23 = smov 0   ;;  %s1393_s24 = smov 0  }
   0xf LB: > { %1754 = sst [smem:[#allocation15_spill]] %s1303_s21  ;;  %s1408_s25 = sadd.s32 4294967295, %s1315_s24   ;;  %s1315_s24 = sphi %s1393_s24, %s1775_s24   ;;  %s1311_s23 = sphi %s1391_s23, %s1777_s23   ;;  %s1307_s22 = sphi %s1389_s22, %s1779_s22   ;;  %s1303_s21 = sphi %s1387_s21, %s1778_s21  }
  0x10   : > { %1755 = sst [smem:[#allocation16_spill]] %s1311_s23  ;;  %s994_s26 = sadd.s32 4294967294, %s1315_s24  }
  0x11   : > { %1756 = sst [smem:[#allocation17_spill]] %s1315_s24  ;;  %s1412_s27 = sadd.s32 1, %s1315_s24  }
  0x12   : > { %1757 = sst [smem:[#allocation18_spill]] %s1412_s27  ;;  %s41_s28 = sadd.s32 1, %s1311_s23 }
  0x13   : > { %s38_s29 = ssub.s32 %s1315_s24, %s1412_s27  ;;  %p48_p0 = scmp.ne.s32.totalorder %s1311_s23, %s1307_s22 }
  0x14   : > { %p39_p1 = scmp.eq.s32.totalorder %s38_s29, 0  ;;  %p49_p2 = scmp.eq.s32.totalorder %s1315_s24, 0 }
  0x15   : > { %p54_p3 = scmp.ne.s32.totalorder %s1307_s22, %s1303_s21  ;;  %p55_p4 = scmp.eq.s32.totalorder %s1408_s25, 0 }
  0x16   : > { %s1424_s30 = scalar_select %p39_p1, %s1311_s23, %s41_s28  }
  0x17   : > { %p50_p5 = por %p49_p2, %p48_p0  ;;  %p1426_p6 = por %p55_p4, %p54_p3 }
  0x18   : > { %1758 = sst [smem:[#allocation19_spill]] %s1424_s30  ;;  %p324_p7 = scmp.eq.s32.totalorder %s1408_s25, 1 }
  0x19   : > { %p330_p8 = scmp.eq.s32.totalorder %s994_s26, 1  ;;  %p996_p9 = scmp.ge.s32.totalorder %s1315_s24, 2 }
  0x1a   : > { %p1060_p10 = scmp.lt.s32.totalorder %s1315_s24, 2  ;;  %p1433_p11 = por %p324_p7, %p48_p0 }
  0x1b   : > { %p1437_p12 = por %p330_p8, %p54_p3  ;;  %s1442_s16 = sand.u32 1, %s1311_s23  }
  0x1c   : > { %s1760_s14 = scalar_select %p1433_p11, 1, 0 }
  0x1d   : > { %s1762_s15 = scalar_select %p1437_p12, 1, 0 }
  0x1e   : > { %1761 = sst [smem:[#allocation20_spill]] %s1760_s14  ;;  %s1445_s17 = sshll.u32 %s1315_s24, 3 }
  0x1f   : > { %1763 = sst [smem:[#allocation21_spill]] %s1762_s15  ;;  %s1448_s18 = sshll.u32 %s1442_s16, 3 }
  0x20   : > { %p1450_p13 = pnand %p1060_p10, %p50_p5  ;;  %s393_s20 = sand.u32 1, %s1315_s24  }
  0x21   : > { %s1765_s1 = sld [smem:[#allocation22_spill]]  ;;  %s397_s30 = scalar_lea.vmem [#allocation5], %s1448_s18 }
  0x22   : > { %s405_s23 = sshll.u32 %s397_s30, 4  ;;  %p1005_p0 = scmp.ge.s32.totalorder %s1315_s24, 1  ;;  %s406_s23 = int_to_ptr.vmem [resolvable:$true] %s405_s23 }
  0x23   : > { %s1461_s15 = scalar_lea.sflag [#allocation6], %s393_s20  ;;  %p1125_p2 = pneg %p1450_p13 }
  0x27   : > { %s401_s29 = scalar_lea.hbm %s1765_s1, %s1445_s17  ;;  %s1128_s30 = scalar_lea.hbm %s1765_s1, 16 }
  0x28   : > { %s403_s27 = sshll.u32 %s401_s29, 4  ;;  %s404_s27 = int_to_ptr.hbm [resolvable:$true] %s403_s27 }
  0x29   : > { %s1121_s21 = sshra.s32 %s404_s27, 4  ;;  %s1122_s21 = int_to_ptr.hbm [resolvable:$true] %s1121_s21 }
  0x2a   : > { %s1123_s14 = scalar_lea.hbm %s1122_s21, 8  ;;  %p1129_p5 = scmp.lt.s32.totalorder %s1122_s21, %s1765_s1 }
  0x2b   : > { %p1124_p1 = scmp.ne.s32.totalorder %s1122_s21, %s1123_s14  ;;  %p1130_p7 = scmp.lt.s32.totalorder %s1128_s30, %s1123_s14 }
  0x2d   : > { %p1126_p3 = pnand %p1125_p2, %p1124_p1  ;;  %p1131_p8 = por %p1130_p7, %p1129_p5 }
  0x2f   : > { %p1127_p4 = pneg %p1126_p3 }
  0x31   : > { %p1132_p10 = pnand %p1131_p8, %p1127_p4 }
  0x33   : > { %1135 = shalt.err (!%p1132_p10)
}
  0x34   : > { %1049 = dma.hbm_to_vmem [thread:$0]  (!%p1450_p13), %s404_s27, 128, %s406_s23, %s1461_s15  }
  0x35   : > { %p448_p1 = scmp.lt.s32.totalorder %s1315_s24, 3  ;;  %s382_s12 = scalar_lea.hbm %s1726_s0, %s1445_s17 }
  0x36   : > { %s384_s14 = sshll.u32 %s382_s12, 4  ;;  %s378_s28 = scalar_lea.vmem [#allocation2], %s1448_s18  ;;  %s385_s14 = int_to_ptr.hbm [resolvable:$true] %s384_s14 }
  0x37   : > { %p1484_p3 = pnand %p1005_p0, %p448_p1  ;;  %s386_s30 = sshll.u32 %s378_s28, 4  ;;  %s387_s30 = int_to_ptr.vmem [resolvable:$true] %s386_s30 }
  0x38   : > { %s375_s29 = scalar_lea.sflag [#allocation3], %s1442_s16  ;;  %s1151_s1 = sshra.s32 %s385_s14, 4  ;;  %s1152_s1 = int_to_ptr.hbm [resolvable:$true] %s1151_s1 }
  0x39   : > { %s1153_s11 = scalar_lea.hbm %s1152_s1, 8  ;;  %s1158_s20 = scalar_lea.hbm %s1726_s0, 16 }
  0x3a   : > { %p1154_p4 = scmp.ne.s32.totalorder %s1152_s1, %s1153_s11  ;;  %p1159_p0 = scmp.lt.s32.totalorder %s1152_s1, %s1726_s0 }
  0x3b   : > { %p1160_p8 = scmp.lt.s32.totalorder %s1158_s20, %s1153_s11 }
  0x3c   : > { %p1156_p5 = pnand %p1154_p4, %p1125_p2 }
  0x3d   : > { %p1161_p10 = por %p1160_p8, %p1159_p0 }
  0x3e   : > { %p1157_p7 = pneg %p1156_p5 }
  0x40   : > { %p1162_p1 = pnand %p1161_p10, %p1157_p7 }
  0x42   : > { %1165 = shalt.err (!%p1162_p1)
}
  0x43   : > { %1046 = dma.hbm_to_vmem [thread:$0]  (!%p1450_p13), %s385_s14, 128, %s387_s30, %s375_s29  }
  0x44   : > { %s420_s9 = scalar_lea.hbm %s1728_s2, %s1445_s17  ;;  %s416_s23 = scalar_lea.vmem [#allocation7], %s1448_s18 }
  0x45   : > { %s424_s27 = sshll.u32 %s416_s23, 4  ;;  %s422_s10 = sshll.u32 %s420_s9, 4  ;;  %s425_s27 = int_to_ptr.vmem [resolvable:$true] %s424_s27  ;;  %s423_s10 = int_to_ptr.hbm [resolvable:$true] %s422_s10 }
  0x46   : > { %s1181_s1 = sshra.s32 %s423_s10, 4  ;;  %s1188_s14 = scalar_lea.hbm %s1728_s2, 16  ;;  %s1182_s1 = int_to_ptr.hbm [resolvable:$true] %s1181_s1 }
  0x47   : > { %s1183_s11 = scalar_lea.hbm %s1182_s1, 8  ;;  %p1189_p0 = scmp.lt.s32.totalorder %s1182_s1, %s1728_s2 }
  0x48   : > { %p1184_p4 = scmp.ne.s32.totalorder %s1182_s1, %s1183_s11  ;;  %p1190_p8 = scmp.lt.s32.totalorder %s1188_s14, %s1183_s11 }
  0x4a   : > { %p1186_p5 = pnand %p1184_p4, %p1125_p2  ;;  %p1191_p10 = por %p1190_p8, %p1189_p0 }
  0x4c   : > { %p1187_p7 = pneg %p1186_p5 }
  0x4e   : > { %p1192_p1 = pnand %p1191_p10, %p1187_p7 }
  0x50   : > { %1195 = shalt.err (!%p1192_p1)
}
  0x51   : > { %1052 = dma.hbm_to_vmem [thread:$0]  (!%p1450_p13), %s423_s10, 128, %s425_s27, %s1461_s15  }
  0x52   : > { %s439_s12 = scalar_lea.hbm %s1729_s3, %s1445_s17  ;;  %s435_s23 = scalar_lea.vmem [#allocation8], %s1448_s18 }
  0x53   : > { %s441_s28 = sshll.u32 %s439_s12, 4  ;;  %s443_s24 = sshll.u32 %s435_s23, 4  ;;  %s442_s28 = int_to_ptr.hbm [resolvable:$true] %s441_s28  ;;  %s444_s24 = int_to_ptr.vmem [resolvable:$true] %s443_s24 }
  0x54   : > { %s432_s1 = scalar_lea.sflag [#allocation9], %s1442_s16  ;;  %s1211_s11 = sshra.s32 %s442_s28, 4  ;;  %s1212_s11 = int_to_ptr.hbm [resolvable:$true] %s1211_s11 }
  0x55   : > { %s1213_s20 = scalar_lea.hbm %s1212_s11, 8  ;;  %s1218_s15 = scalar_lea.hbm %s1729_s3, 16 }
  0x56   : > { %p1214_p4 = scmp.ne.s32.totalorder %s1212_s11, %s1213_s20  ;;  %p1219_p0 = scmp.lt.s32.totalorder %s1212_s11, %s1729_s3 }
  0x57   : > { %p1220_p8 = scmp.lt.s32.totalorder %s1218_s15, %s1213_s20 }
  0x58   : > { %p1216_p5 = pnand %p1214_p4, %p1125_p2 }
  0x59   : > { %p1221_p10 = por %p1220_p8, %p1219_p0 }
  0x5a   : > { %p1217_p7 = pneg %p1216_p5 }
  0x5c   : > { %p1222_p1 = pnand %p1221_p10, %p1217_p7 }
  0x5e   : > { %1225 = shalt.err (!%p1222_p1)
}
  0x5f   : > { %1055 = dma.hbm_to_vmem [thread:$0]  (!%p1450_p13), %s442_s28, 128, %s444_s24, %s432_s1  }
  0x60   : > { %452 = sbr.rel (%p1484_p3) target bundleno = 1216 (0x4c0), region = 68  ;;  %s1538_s16 = sand.u32 (!%p1484_p3), 1, %s1307_s22  }
  0x61   : > { %s1541_s18 = sshll.u32 (!%p1484_p3), %s1538_s16, 3  ;;  %s455_s30 = scalar_lea.sflag (!%p1484_p3), [#allocation3], %s1538_s16 }
  0x62   : > { %s458_s29 = scalar_lea.vmem (!%p1484_p3), [#allocation2], %s1541_s18 }
  0x65   : > { %1286 = dma.done.wait (%p1426_p6), %s455_s30, 128  }
  0x66   : > { %1288 = vsyncadd (%p1426_p6), %s455_s30, 4294967168  ;;  %s464_s19 = sand.u32 1, %s1408_s25   ;;  %s468_s9 = scalar_lea.vmem [#allocation5], %s1541_s18 }
  0x67   : > { %s465_s21 = scalar_lea.sflag [#allocation6], %s464_s19 }
  0x68   : > { %1290 = dma.done.wait (%p1426_p6), %s465_s21, 256  }
  0x69   : > { %1292 = vsyncadd (%p1426_p6), %s465_s21, 4294967040  ;;  %s478_s26 = scalar_lea.vmem [#allocation7], %s1541_s18  ;;  %s485_s12 = scalar_lea.sflag [#allocation9], %s1538_s16 }
  0x6a   : > { %s488_s28 = scalar_lea.vmem [#allocation8], %s1541_s18 }
  0x6b   : > { %1294 = dma.done.wait (%p1426_p6), %s485_s12, 128  }
  0x6c   : > { %1296 = vsyncadd (%p1426_p6), %s485_s12, 4294967168  ;;  %v1014_v0 = vld [vmem:[%s1730_s4 + $0x38] sm:$0xff]  ;;  %v1013_v1 = vld [vmem:[%s1730_s4 + $0x30] sm:$0xff]  ;;  %vm556_vm0 = vcmask 261120   ;;  %vm668_vm1 = vcmask 523264   ;;  %v1317_v30 = vmov 64.0  }
  0x6d   : > { %572 = vmatpush.msra.mxu2 %v1014_v0  ;;  %v549_v2 = vld [vmem:[%s1730_s4 + $0x18] sm:$0xff]  ;;  %v1012_v3 = vld [vmem:[%s1730_s4 + $0x28] sm:$0xff]  ;;  %v548_v4 = vld [vmem:[%s1730_s4 + $0x10] sm:$0xff]  ;;  %1109 = vrcp.f32 %v1317_v30  ;;  %s1767_s11 = sld [smem:[#allocation24_spill]]  ;;  %vm792_vm6 = vcmask 31744   ;;  %s1030_s12 = sshll.u32 %s1408_s25, 3 }
  0x6e   : > { %595 = vmatpush.msra.mxu1 %v549_v2  ;;  %v547_v5 = vld [vmem:[%s1730_s4 + $0x8] sm:$0xff]  ;;  %v1025_v6 = vld [vmem:[%s1730_s4 + $0x78] sm:$0xff]  ;;  %v1011_v7 = vld [vmem:[%s1730_s4 + $0x20] sm:$0xff]  ;;  %s1768_s17 = sld [smem:[#allocation23_spill]]  ;;  %s544_s20 = scalar_lea.vmem [#allocation10], %s1541_s18 }
  0x6f   : > { %573 = vmatpush.msra.mxu2 %v1013_v1  ;;  %654 = vmatpush.msra.mxu3 %v1025_v6  ;;  %v1024_v8 = vld [vmem:[%s1730_s4 + $0x70] sm:$0xff]  ;;  %v1020_v10 = vld [vmem:[%s1730_s4 + $0x58] sm:$0xff]  ;;  %v546_v11 = vld [vmem:[%s1730_s4] sm:$0xff]  ;;  %s1769_s21 = sld [smem:[#allocation25_spill]]  ;;  %s855_s14 = sshll.u32 %s544_s20, 4  ;;  %s856_s14 = int_to_ptr.vmem [resolvable:$true] %s855_s14 }
  0x70   : > { %596 = vmatpush.msra.mxu1 %v548_v4  ;;  %v1589_v9 = vld [vmem:[%s468_s9] sm:$0xff]  ;;  %v1599_v12 = vld [vmem:[%s458_s29] sm:$0xff]  ;;  %s843_s25 = scalar_lea.sflag [#allocation4], %s1538_s16 }
  0x71   : > { %574 = vmatpush.msra.mxu2 %v1012_v3  ;;  %655 = vmatpush.msra.mxu3 %v1024_v8  ;;  %v1023_v13 = vld [vmem:[%s1730_s4 + $0x68] sm:$0xff]  ;;  %v1019_v14 = vld [vmem:[%s1730_s4 + $0x50] sm:$0xff]  ;;  %v1022_v15 = vld [vmem:[%s1730_s4 + $0x60] sm:$0xff] }
  0x72   : > { %597 = vmatpush.msra.mxu1 %v547_v5  ;;  %v1018_v16 = vld [vmem:[%s1730_s4 + $0x48] sm:$0xff]  ;;  %v1619_v17 = vld [vmem:[%s488_s28] sm:$0xff]  ;;  %v1017_v18 = vld [vmem:[%s1730_s4 + $0x40] sm:$0xff] }
  0x73   : > { %575 = vmatpush.msra.mxu2 %v1011_v7  ;;  %656 = vmatpush.msra.mxu3 %v1023_v13  ;;  %v1626_v19 = vld [vmem:[%s478_s26] sm:$0xff]  ;;  %v1110_v31 = vpop.eup %1109  ;;  %v724_v42 = vld [vmem:[%s1734_s8 + $0x38] sm:$0xff]  ;;  %v723_v43 = vld [vmem:[%s1734_s8 + $0x30] sm:$0xff]  ;;  %s1770_s26 = sld [smem:[#allocation26_spill]] }
  0x74   : > { %1015 = vmatmul.msk.f32.vlgmr.msra.gmra.mxu2 %vm556_vm0, %v1589_v9  ;;  %598 = vmatpush.msra.mxu1 %v546_v11  ;;  %v1104_v26 = vld [vmem:[%s1731_s5] ss:$0 sm:$0xff]  ;;  %v673_v32 = vmul.f32 64.0, %v1110_v31  ;;  %vm677_vm2 = vweird.f32 %v1110_v31  ;;  %v722_v44 = vld [vmem:[%s1734_s8 + $0x28] sm:$0xff]  ;;  %v720_v48 = vld [vmem:[%s1734_s8 + $0x18] sm:$0xff] }
  0x75   : > { %624 = vmatpush.msrb.mxu2 %v1020_v10  ;;  %1016 = vmatmul.msk.f32.vlgmr.msra.gmra.mxu1 %vm556_vm0, %v1599_v12  ;;  %v721_v45 = vld [vmem:[%s1734_s8 + $0x20] sm:$0xff]  ;;  %v719_v50 = vld [vmem:[%s1734_s8 + $0x10] sm:$0xff]  ;;  %v718_v51 = vld [vmem:[%s1734_s8 + $0x8] sm:$0xff] }
  0x76   : > { %657 = vmatpush.msra.mxu3 %v1022_v15  ;;  %v674_v33 = vsub.f32 1.0, %v673_v32  ;;  %740 = vmatpush.msra.mxu0 %v724_v42  ;;  %v717_v52 = vld [vmem:[%s1734_s8] sm:$0xff]  ;;  %v764_v11 = vld [vmem:[%s1767_s11 + $0x18] sm:$0xff]  ;;  %v763_v13 = vld [vmem:[%s1767_s11 + $0x10] sm:$0xff] }
  0x77   : > { %625 = vmatpush.msrb.mxu2 %v1019_v14  ;;  %1026 = vmatmul.msk.f32.vlgmr.msra.gmra.mxu3 %vm556_vm0, %v1619_v17  ;;  %v1105_v59 = vld [vmem:[%s1732_s6] ss:$0 sm:$0xff]  ;;  %v762_v14 = vld [vmem:[%s1767_s11 + $0x8] sm:$0xff] }
  0x78   : > { %v675_v34 = vmul.f32 %v1110_v31, %v674_v33  ;;  %741 = vmatpush.msra.mxu0 %v723_v43  ;;  %v1106_v61 = vld [vmem:[%s1733_s7] ss:$0 sm:$0xff]  ;;  %784 = vmatpush.msrb.mxu1 %v764_v11 }
  0x79   : > { %626 = vmatpush.msrb.mxu2 %v1018_v16  ;;  %v761_v15 = vld [vmem:[%s1767_s11] sm:$0xff]  ;;  %s853_s24 = scalar_lea.hbm %s1770_s26, %s1030_s12  ;;  %s1261_s27 = scalar_lea.hbm %s1770_s26, 16 }
  0x7a   : > { %v676_v35 = vadd.f32 %v1110_v31, %v675_v34  ;;  %742 = vmatpush.msra.mxu0 %v722_v44  ;;  %785 = vmatpush.msrb.mxu1 %v763_v13  ;;  %v1107_v16 = vld [vmem:[%s1768_s17] ss:$0 sm:$0xff]  ;;  %s857_s10 = sshll.u32 %s853_s24, 4  ;;  %s858_s10 = int_to_ptr.hbm [resolvable:$true] %s857_s10 }
  0x7b   : > { %627 = vmatpush.msrb.mxu2 %v1017_v18  ;;  %v1108_v30 = vld [vmem:[%s1769_s21] ss:$0 sm:$0xff]  ;;  %s1255_s15 = sshra.s32 %s858_s10, 4  ;;  %s1256_s15 = int_to_ptr.hbm [resolvable:$true] %s1255_s15 }
  0x7c   : > { %1021 = vmatmul.msk.f32.vlgmr.msrb.gmra.mxu2 %vm556_vm0, %v1626_v19  ;;  %v678_v36 = vsel %vm677_vm2, %v1110_v31, %v676_v35  ;;  %743 = vmatpush.msra.mxu0 %v721_v45  ;;  %s1257_s13 = scalar_lea.hbm %s1256_s15, 8  ;;  %p1262_p3 = scmp.lt.s32.totalorder %s1256_s15, %s1770_s26 }
  0x7d   : > { %786 = vmatpush.msrb.mxu1 %v762_v14  ;;  %p1258_p6 = scmp.ne.s32.totalorder %s1256_s15, %s1257_s13  ;;  %p1263_p4 = scmp.lt.s32.totalorder %s1261_s27, %s1257_s13 }
  0x7e   : > { %744 = vmatpush.msra.mxu0 %v720_v48 }
  0x7f   : > { %787 = vmatpush.msrb.mxu1 %v761_v15  ;;  %p1259_p13 = pnand %p1258_p6, %p1433_p11  ;;  %p1264_p5 = por %p1263_p4, %p1262_p3 }
  0x80   : > { %745 = vmatpush.msra.mxu0 %v719_v50 }
  0x81   : > { %p1260_p2 = pneg %p1259_p13 }
  0x82   : > { %746 = vmatpush.msra.mxu0 %v718_v51 }
  0x83   : > { %p1265_p7 = pnand %p1264_p5, %p1260_p2 }
  0x84   : > { %747 = vmatpush.msra.mxu0 %v717_v52 }
  0xf2   : > { %v600_v21 = vpop.f32.mrf.mxu1 }
  0xf7   : > { %v577_v20 = vpop.f32.mrf.mxu2 }
  0xf8   : > { %v601_v22 = vadd.f32 %v600_v21, %v577_v20 }
  0xfa   : > { %v659_v24 = vpop.f32.mrf.mxu3 }
  0xff   : > { %v629_v23 = vpop.f32.mrf.mxu2 }
 0x100   : > { %v632_v25 = vadd.f32 %v629_v23, %v601_v22 }
 0x102   : > { %v662_v27 = vadd.f32 %v659_v24, %v632_v25 }
 0x104   : > { %v667_v28 = vadd.f32 %v1104_v26, %v662_v27 }
 0x106   : > { %v669_v29 = vsel %vm668_vm1, %v667_v28, 0.0 }
 0x107   : > { %670 = vadd.xlane.f32.xlu0 %v669_v29 }
 0x17a   : > { %v671_v37 = vpop.xlane.xlu0 %670 }
 0x17b   : > { %v679_v38 = vmul.f32 %v678_v36, %v671_v37 }
 0x17d   : > { %v680_v39 = vsub.f32 %v667_v28, %v679_v38 }
 0x17f   : > { %v681_v40 = vmul.f32 %v680_v39, %v680_v39 }
 0x181   : > { %v682_v41 = vsel %vm668_vm1, %v681_v40, 0.0  ;;  %v1319_v40 = vmov 2  }
 0x182   : > { %683 = vadd.xlane.f32.xlu0 %v682_v41  ;;  %v1320_v41 = vmov 0  }
 0x183   : > { %1101 = vset.pattern.permute.xlu0 %v1319_v40  ;;  %1099 = vset.pattern.permute.xlu2 %v1320_v41 }
 0x1f5   : > { %v684_v46 = vpop.xlane.xlu0 %683 }
 0x1f6   : > { %v685_v47 = vmul.f32 %v684_v46, %v678_v36 }
 0x1f8   : > { %v686_v49 = vadd.f32 1e-05, %v685_v47 }
 0x1fa   : > { %1111 = vrsqrt.f32 %v686_v49  ;;  %vm693_vm4 = vweird.f32 %v686_v49 }
 0x200   : > { %v1112_v53 = vpop.eup %1111 }
 0x201   : > { %v688_v54 = vmul.f32 %v1112_v53, %v686_v49  ;;  %vm694_vm3 = vweird.f32 %v1112_v53 }
 0x202   : > { %vm695_vm5 = vmor %vm693_vm4, %vm694_vm3 }
 0x203   : > { %v689_v55 = vmul.f32 %v1112_v53, %v688_v54  ;;  %v1321_v54 = vmov 1  }
 0x205   : > { %v690_v56 = vmul.f32 0.5, %v689_v55 }
 0x207   : > { %v691_v57 = vsub.f32 1.5, %v690_v56 }
 0x209   : > { %v692_v58 = vmul.f32 %v1112_v53, %v691_v57 }
 0x20b   : > { %v696_v60 = vsel %vm695_vm5, %v1112_v53, %v692_v58 }
 0x20c   : > { %v697_v62 = vmul.f32 %v696_v60, %v680_v39  ;;  %v1318_v39 = vmov 3  }
 0x20d   : > { %1102 = vset.pattern.permute.xlu1 %v1318_v39 }
 0x20e   : > { %v702_v63 = vmul.f32 %v1105_v59, %v697_v62 }
 0x210   : > { %v707_v0 = vadd.f32 %v1106_v61, %v702_v63 }
 0x212   : > { %v709_v1 = vmul.f32 0.044715, %v707_v0  ;;  %v708_v7 = vmul.f32 0.5, %v707_v0 }
 0x214   : > { %v710_v2 = vmul.f32 %v709_v1, %v707_v0 }
 0x216   : > { %v711_v3 = vmul.f32 %v710_v2, %v707_v0 }
 0x218   : > { %v712_v4 = vadd.f32 %v711_v3, %v707_v0 }
 0x21a   : > { %v713_v5 = vmul.f32 0.7978846, %v712_v4 }
 0x21c   : > { %1113 = vtanh.f32 %v713_v5 }
 0x222   : > { %v1114_v6 = vpop.eup %1113 }
 0x223   : > { %v715_v8 = vadd.f32 1.0, %v1114_v6 }
 0x225   : > { %v716_v10 = vmul.f32 %v715_v8, %v708_v7 }
 0x227   : > { %1027 = vmatmul.msk.f32.vlgmr.msra.gmra.mxu0 %vm668_vm1, %v716_v10 }
 0x2a4   : > { %v749_v18 = vpop.f32.mrf.mxu0 }
 0x2a5   : > { %v750_v20 = vadd.f32 %v1107_v16, %v749_v18 }
 0x2a7   : > { %v753_v21 = vmul.f32 0.044715, %v750_v20  ;;  %v752_v27 = vmul.f32 0.5, %v750_v20 }
 0x2a9   : > { %v754_v22 = vmul.f32 %v753_v21, %v750_v20 }
 0x2ab   : > { %v755_v23 = vmul.f32 %v754_v22, %v750_v20 }
 0x2ad   : > { %v756_v24 = vadd.f32 %v755_v23, %v750_v20 }
 0x2af   : > { %v757_v25 = vmul.f32 0.7978846, %v756_v24 }
 0x2b1   : > { %1115 = vtanh.f32 %v757_v25 }
 0x2b7   : > { %v1116_v26 = vpop.eup %1115 }
 0x2b8   : > { %v759_v28 = vadd.f32 1.0, %v1116_v26 }
 0x2ba   : > { %v760_v29 = vmul.f32 %v759_v28, %v752_v27 }
 0x2bc   : > { %1028 = vmatmul.msk.f32.vlgmr.msrb.gmra.mxu1 %vm556_vm0, %v760_v29 }
 0x339   : > { %v789_v31 = vpop.f32.mrf.mxu1 }
 0x33a   : > { %v790_v32 = vadd.f32 %v1108_v30, %v789_v31 }
 0x33c   : > { %v793_v33 = vsel %vm792_vm6, %v790_v32, -inf }
 0x33d   : > { %794 = vmax.xlane.f32.xlu1 %v793_v33 }
 0x3b0   : > { %v795_v34 = vpop.xlane.xlu1 %794 }
 0x3b1   : > { %v796_v35 = vsub.f32 %v790_v32, %v795_v34 }
 0x3b3   : > { %v797_v36 = vmul.f32 1.442695, %v796_v35 }
 0x3b5   : > { %1117 = vpow2.f32 %v797_v36 }
 0x3bb   : > { %v1118_v37 = vpop.eup %1117 }
 0x3bc   : > { %v799_v38 = vsel %vm792_vm6, %v1118_v37, 0.0 }
 0x3bd   : > { %800 = vadd.xlane.f32.xlu1 %v799_v38 }
 0x430   : > { %v801_v42 = vpop.xlane.xlu1 %800 }
 0x431   : > { %1119 = vrcp.f32 %v801_v42  ;;  %v813_v46 = vand.u32 2147483648, %v801_v42  ;;  %v811_v48 = vand.u32 2147483647, %v801_v42  ;;  %vm807_vm8 = vweird.f32 %v801_v42 }
 0x433   : > { %v814_v50 = vor.u32 1.1754944e-38, %v813_v46  ;;  %vm812_vm10 = vcmp.eq.f32.partialorder %v811_v48, 8.507059e+37 }
 0x437   : > { %v1120_v43 = vpop.eup %1119 }
 0x438   : > { %v803_v44 = vmul.f32 %v1120_v43, %v801_v42  ;;  %vm808_vm7 = vweird.f32 %v1120_v43 }
 0x439   : > { %vm809_vm9 = vmor %vm807_vm8, %vm808_vm7 }
 0x43a   : > { %v804_v45 = vsub.f32 1.0, %v803_v44 }
 0x43c   : > { %v805_v47 = vmul.f32 %v1120_v43, %v804_v45 }
 0x43e   : > { %v806_v49 = vadd.f32 %v1120_v43, %v805_v47 }
 0x440   : > { %v810_v51 = vsel %vm809_vm9, %v1120_v43, %v806_v49 }
 0x441   : > { %v815_v52 = vsel %vm812_vm10, %v814_v50, %v810_v51 }
 0x442   : > { %v816_v53 = vmul.f32 %v1118_v37, %v815_v52 }
 0x444   : > { %836 = vperm.xlu1 %1102, %v816_v53   ;;  %830 = vperm.xlu0 %1101, %v816_v53  }
 0x445   : > { %819 = vperm.xlu2 %1099, %v816_v53  }
 0x44c   : > { %1103 = vset.pattern.permute.xlu0 %v1318_v39 }
 0x44d   : > { %1100 = vset.pattern.permute.xlu2 %v1321_v54 }
 0x44e   : > { %824 = vperm.xlu2 %1100, %v816_v53  }
 0x49f   : > { %v820_v55 = vpop.permute.xlu2 %819 }
 0x4a0   : > { %v822_v58 = vmul.f32 %v820_v55, %v1599_v12 }
 0x4a8   : > { %v825_v56 = vpop.permute.xlu2 %824 }
 0x4a9   : > { %v827_v57 = vmul.f32 %v825_v56, %v1589_v9 }
 0x4ab   : > { %v828_v61 = vadd.f32 %v827_v57, %v822_v58 }
 0x4b6   : > { %v837_v59 = vpop.permute.xlu1 %836  ;;  %v831_v60 = vpop.permute.xlu0 %830 }
 0x4b7   : > { %v833_v62 = vmul.f32 %v831_v60, %v1626_v19  ;;  %v839_v63 = vmul.f32 %v837_v59, %v1619_v17 }
 0x4b9   : > { %v834_v0 = vadd.f32 %v833_v62, %v828_v61 }
 0x4bb   : > { %v840_v9 = vadd.f32 %v839_v63, %v834_v0 }
 0x4bd   : > { %841 = vst.msk [vmem:[%s544_s20] sm:$0xff] %vm556_vm0, %v840_v9 }
 0x4be   : > { %1268 = shalt.err (!%p1265_p7)
}
 0x4bf   : > { %1041 = dma.vmem_to_hbm [thread:$0]  (%p1433_p11), %s856_s14, 128, %s858_s10, %s843_s25  }
 0x4c0 PF: > { %s1772_s16 = sld [smem:[#allocation15_spill]]  ;;  %p1057_p0 = pnand %p996_p9, %p1437_p12 }
 0x4c2   : > { %p1058_p8 = pneg %p1057_p0 }
 0x4c6   : > { %s869_s21 = sand.u32 1, %s1772_s16  }
 0x4c7   : > { %s870_s12 = scalar_lea.sflag [#allocation4], %s869_s21 }
 0x4c8   : > { %1298 = dma.done.wait (%p1058_p8), %s870_s12, 128  }
 0x4c9   : > { %1300 = vsyncadd (%p1058_p8), %s870_s12, 4294967168  ;;  %s1775_s24 = sld [smem:[#allocation18_spill]]  ;;  %s1778_s21 = smov %s1307_s22 }
 0x4ca   : > { %s1776_s28 = sld [smem:[#allocation16_spill]] }
 0x4cb   : > { %s1777_s23 = sld [smem:[#allocation19_spill]] }
 0x4cf   : > { %p31_p10 = scmp.ge.s32.totalorder %s1775_s24, 4  }
 0x4d0   : > { %s1779_s22 = smov %s1776_s28 }
 0x4d1   :  { %33 = sbr.rel (!%p31_p10) target bundleno = 15 (0xf), region = 153 }
 0x4d6   :  { %876 = vsyncpa [#allocation3], 1 }
 0x4d7   :  { %878 = vsyncpa [#allocation3 + $0x1], 1 }
 0x4d8   :  { %879 = vsyncpa [#allocation6], 1 }
 0x4d9   :  { %881 = vsyncpa [#allocation6 + $0x1], 1 }
 0x4da   :  { %882 = vsyncpa [#allocation9], 1 }
 0x4db   :  { %884 = vsyncpa [#allocation9 + $0x1], 1 }
 0x4dc   :  { %885 = vsyncpa [#allocation4], 1 }
 0x4dd   :  { %887 = vsyncpa [#allocation4 + $0x1], 1 }

</bundles_post_ra>
